<compile_context>
chip_gen: v7x
topology: tpu7x:2x2x1
jax: 0.10.0
libtpu: 0.0.40
codegen_flags: <defaults>
</compile_context>

<pallas_src>
import functools

import jax
import jax.numpy as jnp
from jax.experimental import pallas as pl
from jax.experimental.pallas import tpu as pltpu


def _mos_head_kernel(x_ref, o_ref, acc_ref, *, t_tile, tiles_per_slice, total_t):
    """Grid: (parallel time-slice p, reduction time-tile t).

    x_ref  : (B, t_tile, D) VMEM  -- tile of SSL features (any float dtype)
    o_ref  : (1, B, D)      VMEM  -- this slice's partial sum_T(x), lane-dense
    acc_ref: (B, 8, D)      VMEM  -- running sublane-wise partial sums (f32)
    """
    p = pl.program_id(0)
    t = pl.program_id(1)
    B, _, D = x_ref.shape

    @pl.when(t == 0)
    def _():
        acc_ref[...] = jnp.zeros_like(acc_ref)

    # Un-clamped global tile start.  The index_map clamps the DMA block index
    # for padded / duplicated tail tiles; masking with the *un-clamped* start
    # here makes any such tile contribute exactly zero.
    start = (p * tiles_per_slice + t) * t_tile

    @pl.when(start + t_tile <= total_t)                       # fully valid tile
    def _():
        # Fused load + cast + group-of-8 reduce: splitting the sublane axis on
        # an 8-row boundary keeps the axis-1 sum as pure vreg-wise VALU adds.
        xf = x_ref[...].astype(jnp.float32).reshape(B, t_tile // 8, 8, D)
        acc_ref[...] += jnp.sum(xf, axis=1)

    @pl.when(start + t_tile > total_t)                        # tail / padded tile
    def _():
        tids = start + jax.lax.broadcasted_iota(jnp.int32, (1, t_tile, 1), 1)
        xm = jnp.where(tids < total_t, x_ref[...].astype(jnp.float32), 0.0)
        acc_ref[...] += jnp.sum(xm.reshape(B, t_tile // 8, 8, D), axis=1)

    @pl.when(t == pl.num_programs(1) - 1)
    def _():
        # Single cross-sublane (XLU) reduce at finalize, not per grid step.
        o_ref[...] = jnp.sum(acc_ref[...], axis=1)[None, :, :].astype(o_ref.dtype)


def _pick_t_tile(B, T, D, itemsize, sub):
    """Largest time tile keeping the double-buffered stream well inside VMEM."""
    try:
        info = pltpu.get_tpu_info()
        vmem_cap = int(getattr(info, "vmem_capacity_bytes", 64 << 20))
    except Exception:
        vmem_cap = 64 << 20                  # v7x floor; safe on every generation
    budget = vmem_cap // 6                   # x double-buffered + f32 reduce temp
    t_tile = budget // (2 * B * D * itemsize)
    t_tile = max(sub, (t_tile // sub) * sub)
    t_tile = min(t_tile, 512)                # roofline saturates ~512; save VMEM
    padded_t = ((T + sub - 1) // sub) * sub
    t_tile = min(t_tile, padded_t)           # never exceed (padded) T
    t_tile = max(sub, (t_tile // sub) * sub)
    return int(t_tile), vmem_cap


def _default_num_parallel():
    """2 on v7x (2 TensorCores/chip); 1 on single-TC v5e/v6e (split = overhead)."""
    try:
        kind = jax.devices()[0].device_kind.lower()
    except Exception:
        return 1
    return 2 if ("v7" in kind or "7x" in kind) else 1


def mos_predictor_forward(x, w, b, *, t_tile=None, num_parallel=None):
    """utt_score = mean_T(x @ w + b), streaming sum computed in a Pallas kernel.

    x: (B, T, D) float32 or bfloat16 SSL features (bf16 halves HBM traffic),
    w: (D, 1), b: (1,)  ->  (B,) float32
    """
    B, T, D = x.shape
    itemsize = jnp.dtype(x.dtype).itemsize
    sub = max(8, 32 // itemsize)             # sublane tile: 8 f32 / 16 bf16 / 32 i8
    auto_tile, vmem_cap = _pick_t_tile(B, T, D, itemsize, sub)
    if t_tile is None:
        t_tile = auto_tile
    assert t_tile % sub == 0, (
        f"time tile must be a multiple of {sub} for dtype {x.dtype}")

    if num_parallel is None:
        num_parallel = _default_num_parallel()

    num_tiles = pl.cdiv(T, t_tile)
    P = max(1, min(num_parallel, num_tiles))       # TC split of the time axis
    tiles_per_slice = pl.cdiv(num_tiles, P)
    grid = (P, tiles_per_slice)

    # VMEM accounting: double-buffered x stream + worst-case f32 reduce temp
    # + (B, 8, D) accumulator + double-buffered (1, B, D) output block.
    x_stream = 2 * B * t_tile * D * itemsize
    f32_tmp = B * t_tile * D * 4
    acc_bytes = B * 8 * D * 4
    out_bytes = 2 * B * D * 4
    vmem_limit = x_stream + f32_tmp + acc_bytes + out_bytes + (8 << 20)
    vmem_limit = int(min(max(vmem_limit, 32 << 20), (vmem_cap * 3) // 4))

    def x_index_map(p, t):
        idx = p * tiles_per_slice + t
        return (0, jnp.minimum(idx, num_tiles - 1), 0)   # clamp padded tail

    kernel = functools.partial(
        _mos_head_kernel, t_tile=t_tile, tiles_per_slice=tiles_per_slice,
        total_t=T)

    partials = pl.pallas_call(
        kernel,
        out_shape=jax.ShapeDtypeStruct((P, B, D), jnp.float32),
        grid_spec=pltpu.PrefetchScalarGridSpec(
            num_scalar_prefetch=0,
            grid=grid,
            in_specs=[pl.BlockSpec((B, t_tile, D), x_index_map)],   # x time tile
            out_specs=pl.BlockSpec((1, B, D), lambda p, t: (p, 0, 0)),
            scratch_shapes=[pltpu.VMEM((B, 8, D), jnp.float32)],
        ),
        compiler_params=pltpu.CompilerParams(
            dimension_semantics=("parallel", "arbitrary"),
            vmem_limit_bytes=vmem_limit,
        ),
    )(x)

    # Tiny epilogue in plain JAX: combine the parallel partial sums, one
    # (B, D) @ (D, 1) matmul, mean scale and bias.
    sums = jnp.sum(partials, axis=0)                                  # (B, D)
    utt = jnp.dot(sums, w.astype(jnp.float32))[:, 0] * (1.0 / T)      # (B,)
    return utt + b[0].astype(jnp.float32)


if __name__ == "__main__":
    # Shapes consistent with MOS_Predictor("wavlm_base", hdim=128, use_lstm=False):
    #   feature_dim (D) = 768, small batch / sequence for the test.
    B, T, D = 2, 40, 768

    key = jax.random.PRNGKey(0)
    kx, kw, kb = jax.random.split(key, 3)

    # SSL features (stand-in for ssl_model(audio, audio_length) output)
    x = jax.random.normal(kx, (B, T, D), dtype=jnp.float32)

    # torch.nn.Linear(D, 1) init: U(-1/sqrt(D), 1/sqrt(D)) for weight and bias.
    bound = 1.0 / jnp.sqrt(jnp.float32(D))
    w = jax.random.uniform(kw, (D, 1), minval=-bound, maxval=bound,
                           dtype=jnp.float32)
    b = jax.random.uniform(kb, (1,), minval=-bound, maxval=bound,
                           dtype=jnp.float32)

    # Pure-JAX reference for the same forward pass.
    frame_ref = jnp.einsum("btd,do->bto", x, w)[..., 0] + b[0]   # (B, T)
    utt_ref = jnp.mean(frame_ref, axis=1)                        # (B,)

    # 1) Small explicit tile + forced 2-way split: exercises multi-tile
    #    reduction, tail masking and duplicated-tile clamping.
    utt_a = jax.block_until_ready(
        mos_predictor_forward(x, w, b, t_tile=16, num_parallel=2))
    # 2) Auto-sized tile / auto TC split: the production config.
    utt_b = jax.block_until_ready(mos_predictor_forward(x, w, b))
    # 3) bfloat16 features (halves HBM bytes), auto config: 16-row sublane tile.
    utt_c = jax.block_until_ready(
        mos_predictor_forward(x.astype(jnp.bfloat16), w, b))
    # 4) bfloat16 with a small explicit tile + 2-way split: bf16 tail masking.
    utt_d = jax.block_until_ready(
        mos_predictor_forward(x.astype(jnp.bfloat16), w, b,
                              t_tile=16, num_parallel=2))

    assert utt_a.shape == (B,)
    assert jnp.allclose(utt_a, utt_ref, atol=1e-4, rtol=1e-4), (utt_a, utt_ref)
    assert jnp.allclose(utt_b, utt_ref, atol=1e-4, rtol=1e-4), (utt_b, utt_ref)
    assert jnp.allclose(utt_c, utt_ref, atol=5e-2, rtol=5e-2), (utt_c, utt_ref)
    assert jnp.allclose(utt_d, utt_ref, atol=5e-2, rtol=5e-2), (utt_d, utt_ref)

    print("KERNEL_OK")
</pallas_src>

<mosaic_0001>
module attributes {stable_mosaic.version = 11 : i64} {
  func.func @_mos_head_kernel(%arg0: i32, %arg1: i32, %arg2: memref<2x16x768xf32, #tpu.memory_space<vmem>>, %arg3: memref<1x2x768xf32, #tpu.memory_space<vmem>>, %arg4: memref<2x8x768xf32, #tpu.memory_space<vmem>>) attributes {dimension_semantics = [#tpu.dimension_semantics<parallel>, #tpu.dimension_semantics<arbitrary>], iteration_bounds = array<i64: 2, 2>, scalar_prefetch = 0 : i64, scratch_operands = 1 : i64, tpu.core_type = #tpu.core_type<tc>, window_params = [{transform_indices = @transform_0, window_bounds = array<i64: 2, 16, 768>}, {transform_indices = @transform_1, window_bounds = array<i64: 1, 2, 768>}]} {
    %c0_i32 = arith.constant 0 : i32
    %0 = arith.cmpi eq, %arg1, %c0_i32 : i32
    %1 = arith.extui %0 : i1 to i32
    %c0_i32_0 = arith.constant 0 : i32
    %2 = arith.cmpi ne, %1, %c0_i32_0 : i32
    scf.if %2 {
      %cst = arith.constant 0.000000e+00 : f32
      %17 = vector.broadcast %cst : f32 to vector<2x8x768xf32>
      %c0 = arith.constant 0 : index
      %c0_7 = arith.constant 0 : index
      %c0_8 = arith.constant 0 : index
      %18 = vector.load %arg4[%c0, %c0_7, %c0_8] : memref<2x8x768xf32, #tpu.memory_space<vmem>>, vector<2x8x768xf32>
      tpu.vector_store %arg4[%c0, %c0_7, %c0_8], %17 {strides = array<i32>} : memref<2x8x768xf32, #tpu.memory_space<vmem>>, vector<2x8x768xf32>,
    } else {
    }
    %c2_i32 = arith.constant 2 : i32
    %3 = arith.muli %arg0, %c2_i32 : i32
    %4 = arith.addi %3, %arg1 : i32
    %c16_i32 = arith.constant 16 : i32
    %5 = arith.muli %4, %c16_i32 : i32
    %c16_i32_1 = arith.constant 16 : i32
    %6 = arith.addi %5, %c16_i32_1 : i32
    %c40_i32 = arith.constant 40 : i32
    %7 = arith.cmpi sle, %6, %c40_i32 : i32
    %8 = arith.extui %7 : i1 to i32
    %c0_i32_2 = arith.constant 0 : i32
    %9 = arith.cmpi ne, %8, %c0_i32_2 : i32
    scf.if %9 {
      %c0 = arith.constant 0 : index
      %c0_7 = arith.constant 0 : index
      %c0_8 = arith.constant 0 : index
      %17 = vector.load %arg2[%c0, %c0_7, %c0_8] : memref<2x16x768xf32, #tpu.memory_space<vmem>>, vector<2x16x768xf32>
      %18 = vector.shape_cast %17 : vector<2x16x768xf32> to vector<2x2x8x768xf32>
      %c0_9 = arith.constant 0 : index
      %c0_10 = arith.constant 0 : index
      %c0_11 = arith.constant 0 : index
      %19 = vector.load %arg4[%c0_9, %c0_10, %c0_11] : memref<2x8x768xf32, #tpu.memory_space<vmem>>, vector<2x8x768xf32>
      %cst = arith.constant dense<0.000000e+00> : vector<2x8x768xf32>
      %20 = vector.multi_reduction <add>, %18, %cst [1] : vector<2x2x8x768xf32> to vector<2x8x768xf32>
      %21 = arith.addf %19, %20 : vector<2x8x768xf32>
      %c0_12 = arith.constant 0 : index
      %c0_13 = arith.constant 0 : index
      %c0_14 = arith.constant 0 : index
      %22 = vector.load %arg4[%c0_12, %c0_13, %c0_14] : memref<2x8x768xf32, #tpu.memory_space<vmem>>, vector<2x8x768xf32>
      tpu.vector_store %arg4[%c0_12, %c0_13, %c0_14], %21 {strides = array<i32>} : memref<2x8x768xf32, #tpu.memory_space<vmem>>, vector<2x8x768xf32>,
    } else {
    }
    %c16_i32_3 = arith.constant 16 : i32
    %10 = arith.addi %5, %c16_i32_3 : i32
    %c40_i32_4 = arith.constant 40 : i32
    %11 = arith.cmpi sgt, %10, %c40_i32_4 : i32
    %12 = arith.extui %11 : i1 to i32
    %c0_i32_5 = arith.constant 0 : i32
    %13 = arith.cmpi ne, %12, %c0_i32_5 : i32
    scf.if %13 {
      %17 = tpu.iota {dimensions = array<i32: 1>} : vector<1x16x1xi32>
      %18 = vector.broadcast %5 : i32 to vector<1x16x1xi32>
      %19 = arith.addi %18, %17 : vector<1x16x1xi32>
      %c40_i32_7 = arith.constant 40 : i32
      %20 = vector.broadcast %c40_i32_7 : i32 to vector<1x16x1xi32>
      %21 = arith.cmpi slt, %19, %20 : vector<1x16x1xi32>
      %c0 = arith.constant 0 : index
      %c0_8 = arith.constant 0 : index
      %c0_9 = arith.constant 0 : index
      %22 = vector.load %arg2[%c0, %c0_8, %c0_9] : memref<2x16x768xf32, #tpu.memory_space<vmem>>, vector<2x16x768xf32>
      %cst = arith.constant 0.000000e+00 : f32
      %23 = vector.shape_cast %21 : vector<1x16x1xi1> to vector<1x16x1xi1>
      %24 = vector.broadcast %23 : vector<1x16x1xi1> to vector<2x16x768xi1>
      %25 = vector.broadcast %cst : f32 to vector<2x16x768xf32>
      %26 = arith.select %24, %22, %25 : vector<2x16x768xi1>, vector<2x16x768xf32>
      %c0_10 = arith.constant 0 : index
      %c0_11 = arith.constant 0 : index
      %c0_12 = arith.constant 0 : index
      %27 = vector.load %arg4[%c0_10, %c0_11, %c0_12] : memref<2x8x768xf32, #tpu.memory_space<vmem>>, vector<2x8x768xf32>
      %28 = vector.shape_cast %26 : vector<2x16x768xf32> to vector<2x2x8x768xf32>
      %cst_13 = arith.constant dense<0.000000e+00> : vector<2x8x768xf32>
      %29 = vector.multi_reduction <add>, %28, %cst_13 [1] : vector<2x2x8x768xf32> to vector<2x8x768xf32>
      %30 = arith.addf %27, %29 : vector<2x8x768xf32>
      %c0_14 = arith.constant 0 : index
      %c0_15 = arith.constant 0 : index
      %c0_16 = arith.constant 0 : index
      %31 = vector.load %arg4[%c0_14, %c0_15, %c0_16] : memref<2x8x768xf32, #tpu.memory_space<vmem>>, vector<2x8x768xf32>
      tpu.vector_store %arg4[%c0_14, %c0_15, %c0_16], %30 {strides = array<i32>} : memref<2x8x768xf32, #tpu.memory_space<vmem>>, vector<2x8x768xf32>,
    } else {
    }
    %c1_i32 = arith.constant 1 : i32
    %14 = arith.cmpi eq, %arg1, %c1_i32 : i32
    %15 = arith.extui %14 : i1 to i32
    %c0_i32_6 = arith.constant 0 : i32
    %16 = arith.cmpi ne, %15, %c0_i32_6 : i32
    scf.if %16 {
      %c0 = arith.constant 0 : index
      %c0_7 = arith.constant 0 : index
      %c0_8 = arith.constant 0 : index
      %17 = vector.load %arg4[%c0, %c0_7, %c0_8] : memref<2x8x768xf32, #tpu.memory_space<vmem>>, vector<2x8x768xf32>
      %cst = arith.constant dense<0.000000e+00> : vector<2x768xf32>
      %18 = vector.multi_reduction <add>, %17, %cst [1] : vector<2x8x768xf32> to vector<2x768xf32>
      %19 = vector.shape_cast %18 : vector<2x768xf32> to vector<1x2x768xf32>
      %c0_9 = arith.constant 0 : index
      %c0_10 = arith.constant 0 : index
      %c0_11 = arith.constant 0 : index
      %20 = vector.load %arg3[%c0_9, %c0_10, %c0_11] : memref<1x2x768xf32, #tpu.memory_space<vmem>>, vector<1x2x768xf32>
      tpu.vector_store %arg3[%c0_9, %c0_10, %c0_11], %19 {strides = array<i32>} : memref<1x2x768xf32, #tpu.memory_space<vmem>>, vector<1x2x768xf32>,
    } else {
    }
    return
  }
  func.func @transform_0(%arg0: i32, %arg1: i32) -> (i32, i32, i32) {
    %c2_i32 = arith.constant 2 : i32
    %0 = arith.muli %arg0, %c2_i32 : i32
    %1 = arith.addi %0, %arg1 : i32
    %c2_i32_0 = arith.constant 2 : i32
    %2 = arith.minsi %1, %c2_i32_0 : i32
    %c0_i32 = arith.constant 0 : i32
    %c0_i32_1 = arith.constant 0 : i32
    %c0_i32_2 = arith.constant 0 : i32
    return %c0_i32, %2, %c0_i32_1 : i32, i32, i32
  }
  func.func @transform_1(%arg0: i32, %arg1: i32) -> (i32, i32, i32) {
    %c0_i32 = arith.constant 0 : i32
    %c0_i32_0 = arith.constant 0 : i32
    %c0_i32_1 = arith.constant 0 : i32
    return %arg0, %c0_i32, %c0_i32_0 : i32, i32, i32
  }
}

</mosaic_0001>

<bundles_post_ra>
// kernel: tpu_custom_call.1
= control target key start
LH: loop header
LB: loop body
LE: loop exit
PB: predicated region body
PF: predicated region fallthrough
CT: control target
= control target key end

     0   :  { %6 = vsyncpa [#allocation4], 0  ;;  %s1284_s0 = inlined_call_operand.hbm [shape: f32[2,40,768], index: 0, kind: input, shape index: {}]   ;;  %s1285_s1 = inlined_call_operand.hbm [shape: f32[2,2,768], index: 1, kind: output, shape index: {}]  }
   0x1   :  { %8 = vsyncpa [#allocation4 + $0x1], 0 }
   0x2   :  { %9 = vsyncpa [#allocation5], 0 }
   0x3   :  { %11 = vsyncpa [#allocation5 + $0x1], 0  ;;  %s958_s6 = smov 0   ;;  %s960_s7 = smov 0  }
   0x4   :  { %s962_s8 = smov 0   ;;  %s964_s9 = smov 0  }
   0x5   :  { %s966_s10 = smov 0   ;;  %s968_s11 = smov 0  }
   0x6   :  { %s970_s12 = smov 0   ;;  %s972_s13 = smov 0  }
   0x7   :  { %s974_s14 = smov 0   ;;  %s976_s15 = smov 0  }
   0x8   :  { %s978_s16 = smov 0  }
   0x9 LB: > { %1291 = sst [smem:[#allocation11_spill]] %s918_s11  ;;  %s681_s17 = sadd.s32 4294967295, %s938_s16   ;;  %s938_s16 = sphi %s978_s16, %s17_s16   ;;  %s934_s15 = sphi %s976_s15, %s1306_s15   ;;  %s930_s14 = sphi %s974_s14, %s1305_s14   ;;  %s926_s13 = sphi %s972_s13, %s1304_s13   ;;  %s922_s12 = sphi %s970_s12, %s1303_s12   ;;  %s918_s11 = sphi %s968_s11, %s1302_s11   ;;  %s914_s10 = sphi %s966_s10, %s1311_s10   ;;  %s910_s9 = sphi %s964_s9, %s1310_s9   ;;  %s906_s8 = sphi %s962_s8, %s1309_s8   ;;  %s902_s7 = sphi %s960_s7, %s1308_s7   ;;  %s898_s6 = sphi %s958_s6, %s1307_s6  }
   0xa   : > { %1292 = sst [smem:[#allocation12_spill]] %s930_s14  ;;  %s682_s18 = sadd.s32 4294967294, %s938_s16  }
   0xb   : > { %1293 = sst [smem:[#allocation13_spill]] %s934_s15  ;;  %s26_s19 = sadd.s32 1, %s930_s14 }
   0xc   : > { %s29_s20 = sadd.s32 1, %s934_s15  ;;  %p27_p0 = scmp.ge.s32.totalorder %s26_s19, 2 }
   0xd   : > { %s683_s21 = sshll.u32 %s934_s15, 1  ;;  %s44_s23 = sadd.s32 1, %s918_s11 }
   0xe   : > { %s34_s22 = sadd.s32 %s930_s14, %s683_s21  ;;  %s1313_s19 = smov (%p27_p0, %s26_s19), 0 }
   0xf   : > { %1294 = sst [smem:[#allocation14_spill]] %s1313_s19  ;;  %s1315_s20 = smov (!%p27_p0, %s29_s20), %s934_s15 }
  0x10   : > { %p35_p1 = scmp.lt.s32.totalorder %s34_s22, 2  ;;  %p51_p2 = scmp.ne.s32.totalorder %s918_s11, %s914_s10 }
  0x11   : > { %p31_p3 = scmp.ge.s32.totalorder %s1315_s20, 2  ;;  %p52_p4 = scmp.eq.s32.totalorder %s938_s16, 0 }
  0x12   : > { %s1317_s22 = smov (!%p35_p1, %s34_s22), 2  ;;  %p57_p6 = scmp.ne.s32.totalorder %s914_s10, %s910_s9 }
  0x13   : > { %s1319_s20 = smov (%p31_p3, %s1315_s20), 0  ;;  %p1030_p5 = por %p52_p4, %p51_p2 }
  0x14   : > { %1295 = sst [smem:[#allocation15_spill]] %s1319_s20  ;;  %s684_s25 = sshll.u32 %s1319_s20, 1 }
  0x15   : > { %p58_p7 = scmp.eq.s32.totalorder %s681_s17, 0  ;;  %s38_s26 = sadd.s32 %s684_s25, %s1313_s19 }
  0x16   : > { %s67_s27 = ssub.s32 %s934_s15, %s1319_s20  ;;  %p39_p8 = scmp.lt.s32.totalorder %s38_s26, 2 }
  0x17   : > { %p1042_p9 = por %p58_p7, %p57_p6  ;;  %p68_p10 = scmp.eq.s32.totalorder %s67_s27, 0 }
  0x18   : > { %s70_s29 = sadd.s32 1, %s906_s8  ;;  %s1321_s26 = smov (!%p39_p8, %s38_s26), 2 }
  0x19   : > { %s1048_s30 = scalar_select %p68_p10, %s906_s8, %s70_s29  }
  0x1a   : > { %s41_s2 = ssub.s32 %s1317_s22, %s1321_s26  ;;  %p80_p11 = scmp.ne.s32.totalorder %s906_s8, %s902_s7 }
  0x1b   : > { %p42_p12 = scmp.eq.s32.totalorder %s41_s2, 0  ;;  %p81_p13 = scmp.eq.s32.totalorder %s681_s17, 3 }
  0x1c   : > { %p86_p0 = scmp.ne.s32.totalorder %s902_s7, %s898_s6  ;;  %p87_p1 = scmp.eq.s32.totalorder %s682_s18, 3 }
  0x1d   : > { %s1060_s3 = scalar_select %p42_p12, %s918_s11, %s44_s23  }
  0x1e   : > { %p1062_p2 = por %p81_p13, %p80_p11  ;;  %p1066_p3 = por %p87_p1, %p86_p0 }
  0x1f   : > { %1298 = sst [smem:[#allocation16_spill]] %s1060_s3  ;;  %p686_p4 = scmp.ge.s32.totalorder %s938_s16, 4 }
  0x21   : > { %103 = sbr.rel (%p686_p4) target bundleno = 65 (0x41), region = 16 }
  0x28   : > { %106 = sbr.rel (!%p1030_p5) target bundleno = 65 (0x41), region = 20 }
  0x2f   : > { %s107_s9 = sand.u32 1, %s918_s11   ;;  %s688_s17 = sshll.u32 %s1317_s22, 1 }
  0x30   : > { %s708_s18 = smul.u32 192, %s107_s9  ;;  %s117_s21 = ssub.s32 5, %s688_s17 }
  0x31   : > { %p118_p6 = scmp.lt.s32.totalorder %s117_s21, 2  ;;  %s108_s26 = scalar_lea.sflag [#allocation4], %s107_s9 }
  0x32   : > { %s111_s27 = scalar_lea.vmem [#allocation3], %s708_s18 }
  0x33   : > { %s1323_s21 = smov (!%p118_p6, %s117_s21), 2 }
  0x34   : > { %s690_s23 = smul.u32 1536, %s1323_s21 }
  0x36   : > { %s123_s25 = ssub.s32 3072, %s690_s23 }
  0x37   : > { %124 = vsyncadd %s108_s26, %s123_s25  ;;  %p691_p7 = scmp.ne.s32.totalorder %s690_s23, 0  ;;  %s709_s29 = smul.u32 1536, %s1317_s22 }
  0x38   : > { %s135_s2 = sld [smem:[#allocation0]]   ;;  %s143_s20 = sshll.u32 %s111_s27, 4  ;;  %s144_s20 = int_to_ptr.vmem [resolvable:$true] %s143_s20 }
  0x39   : > { %s128_s15 = scalar_lea.hbm %s1284_s0, %s709_s29  ;;  %s940_s14 = smov 3840  }
  0x3a   : > { %150 = sst [smem:[#allocation8]] %s940_s14  ;;  %s941_s17 = smov 1536  }
  0x3b   : > { %152 = sst [smem:[#allocation8 + $0x1]] %s941_s17  ;;  %s942_s11 = smov 768  }
  0x3c   : > { %154 = sst [smem:[#allocation8 + $0x2]] %s1323_s21  ;;  %s943_s18 = smov 48  }
  0x3d   : > { %156 = sst [smem:[#allocation8 + $0x3]] %s942_s11  ;;  %s944_s22 = smov [#allocation7]  }
  0x3e   : > { %s695_s3 = sshll.u32 %s135_s2, 26  ;;  %158 = sst [smem:[#allocation8 + $0x4]] %s942_s11 }
  0x3f   : > { %s696_s9 = sadd.s32 134217728, %s695_s3  ;;  %160 = sst [smem:[#allocation8 + $0x5]] %s943_s18 }
  0x40   : > { %162 = dma.general (%p691_p7), %s128_s15, %s690_s23, %s144_s20, %s108_s26, %s944_s22, [#allocation8], %s696_s9, 0  }
  0x41 PF: > { %p698_p5 = scmp.ge.s32.totalorder %s938_s16, 1  ;;  %p164_p8 = scmp.lt.s32.totalorder %s938_s16, 5 }
  0x43   : > { %p165_p10 = pnand %p698_p5, %p164_p8 }
  0x44   : > { %s170_s14 = sand.u32 (!%p165_p10), 1, %s914_s10  }
  0x45   : > { %168 = sbr.rel (%p165_p10) target bundleno = 196 (0xc4), region = 24  ;;  %s171_s21 = scalar_lea.sflag (!%p165_p10), [#allocation4], %s170_s14 }
  0x46   : > { %s710_s19 = smul.u32 (!%p165_p10), 192, %s170_s14 }
  0x48   : > { %s1083_s3 = scalar_lea.vmem (!%p165_p10), [#allocation3], %s710_s19 }
  0x4c   : > { %889 = dma.done.wait (%p1042_p9), %s171_s21, 3072  }
  0x4d   : > { %891 = vsyncadd (%p1042_p9), %s171_s21, 4294964224  ;;  %s190_s11 = sand.u32 1, %s902_s7   ;;  %p699_p11 = scmp.ne.s32.totalorder %s922_s12, 0 }
  0x4e   : > { %s711_s15 = smul.u32 12, %s190_s11  ;;  %v945_v0 = vmov (!%p699_p11), 0.0  }
  0x4f   : > { %206 = sbr.rel (%p699_p11) target bundleno = 86 (0x56), region = 32  ;;  %207 = vst [vmem:[#allocation2] sm:$0xff] (!%p699_p11), %v945_v0  ;;  %208 = vst [vmem:[#allocation2 + $0x8] sm:$0xff] (!%p699_p11), %v945_v0 }
  0x50   : > { %s1092_s20 = scalar_lea.vmem [#allocation6], %s711_s15  ;;  %209 = vst [vmem:[#allocation2 + $0x10] sm:$0xff] (!%p699_p11), %v945_v0  ;;  %210 = vst [vmem:[#allocation2 + $0x18] sm:$0xff] (!%p699_p11), %v945_v0 }
  0x51   : > { %211 = vst [vmem:[#allocation2 + $0x20] sm:$0xff] (!%p699_p11), %v945_v0  ;;  %212 = vst [vmem:[#allocation2 + $0x28] sm:$0xff] (!%p699_p11), %v945_v0 }
  0x52   : > { %213 = vst [vmem:[#allocation2 + $0x30] sm:$0xff] (!%p699_p11), %v945_v0  ;;  %214 = vst [vmem:[#allocation2 + $0x38] sm:$0xff] (!%p699_p11), %v945_v0 }
  0x53   : > { %215 = vst [vmem:[#allocation2 + $0x40] sm:$0xff] (!%p699_p11), %v945_v0  ;;  %216 = vst [vmem:[#allocation2 + $0x48] sm:$0xff] (!%p699_p11), %v945_v0 }
  0x54   : > { %217 = vst [vmem:[#allocation2 + $0x50] sm:$0xff] (!%p699_p11), %v945_v0  ;;  %218 = vst [vmem:[#allocation2 + $0x58] sm:$0xff] (!%p699_p11), %v945_v0 }
  0x56 PF: > { %s700_s28 = sshll.u32 %s926_s13, 1 }
  0x57   : > { %s1097_s23 = sadd.s32 %s922_s12, %s700_s28 }
  0x58   : > { %s701_s25 = sshll.u32 %s1097_s23, 4 }
  0x59   : > { %s1102_s26 = sadd.s32 16, %s701_s25 }
  0x5a   : > { %p702_p9 = scmp.gt.s32.totalorder %s1102_s26, 40 }
  0x5b   : > { %v227_v1 = vld [vmem:[%s1083_s3] sm:$0xff] (!%p702_p9)  ;;  %v233_v2 = vld [vmem:[%s1083_s3 + $0x30] sm:$0xff] (!%p702_p9)  ;;  %v228_v5 = vld [vmem:[%s1083_s3 + $0x8] sm:$0xff] (!%p702_p9) }
  0x5c   : > { %226 = sbr.rel (%p702_p9) target bundleno = 108 (0x6c), region = 36  ;;  %v251_v3 = vld [vmem:[#allocation2] sm:$0xff] (!%p702_p9)  ;;  %v263_v4 = vadd.f32 (!%p702_p9), %v233_v2, %v227_v1  ;;  %v234_v6 = vld [vmem:[%s1083_s3 + $0x38] sm:$0xff] (!%p702_p9)  ;;  %v252_v7 = vld [vmem:[#allocation2 + $0x8] sm:$0xff] (!%p702_p9) }
  0x5d   : > { %v264_v8 = vadd.f32 (!%p702_p9), %v234_v6, %v228_v5  ;;  %v229_v9 = vld [vmem:[%s1083_s3 + $0x10] sm:$0xff] (!%p702_p9)  ;;  %v235_v10 = vld [vmem:[%s1083_s3 + $0x40] sm:$0xff] (!%p702_p9)  ;;  %v230_v14 = vld [vmem:[%s1083_s3 + $0x18] sm:$0xff] (!%p702_p9) }
  0x5e   : > { %v253_v11 = vld [vmem:[#allocation2 + $0x10] sm:$0xff] (!%p702_p9)  ;;  %v275_v12 = vadd.f32 (!%p702_p9), %v263_v4, %v251_v3  ;;  %v265_v13 = vadd.f32 (!%p702_p9), %v235_v10, %v229_v9  ;;  %v236_v15 = vld [vmem:[%s1083_s3 + $0x48] sm:$0xff] (!%p702_p9)  ;;  %v254_v16 = vld [vmem:[#allocation2 + $0x18] sm:$0xff] (!%p702_p9) }
  0x5f   : > { %v276_v17 = vadd.f32 (!%p702_p9), %v264_v8, %v252_v7  ;;  %v266_v18 = vadd.f32 (!%p702_p9), %v236_v15, %v230_v14  ;;  %v231_v19 = vld [vmem:[%s1083_s3 + $0x20] sm:$0xff] (!%p702_p9)  ;;  %v237_v20 = vld [vmem:[%s1083_s3 + $0x50] sm:$0xff] (!%p702_p9)  ;;  %v232_v24 = vld [vmem:[%s1083_s3 + $0x28] sm:$0xff] (!%p702_p9) }
  0x60   : > { %v255_v21 = vld [vmem:[#allocation2 + $0x20] sm:$0xff] (!%p702_p9)  ;;  %287 = vst [vmem:[#allocation2] sm:$0xff] (!%p702_p9), %v275_v12  ;;  %v277_v22 = vadd.f32 (!%p702_p9), %v265_v13, %v253_v11  ;;  %v267_v23 = vadd.f32 (!%p702_p9), %v237_v20, %v231_v19  ;;  %v238_v25 = vld [vmem:[%s1083_s3 + $0x58] sm:$0xff] (!%p702_p9)  ;;  %v256_v26 = vld [vmem:[#allocation2 + $0x28] sm:$0xff] (!%p702_p9) }
  0x61   : > { %288 = vst [vmem:[#allocation2 + $0x8] sm:$0xff] (!%p702_p9), %v276_v17  ;;  %v278_v27 = vadd.f32 (!%p702_p9), %v266_v18, %v254_v16  ;;  %v268_v28 = vadd.f32 (!%p702_p9), %v238_v25, %v232_v24  ;;  %v239_v29 = vld [vmem:[%s1083_s3 + $0x60] sm:$0xff] (!%p702_p9)  ;;  %v245_v30 = vld [vmem:[%s1083_s3 + $0x90] sm:$0xff] (!%p702_p9)  ;;  %v240_v34 = vld [vmem:[%s1083_s3 + $0x68] sm:$0xff] (!%p702_p9) }
  0x62   : > { %v257_v31 = vld [vmem:[#allocation2 + $0x30] sm:$0xff] (!%p702_p9)  ;;  %289 = vst [vmem:[#allocation2 + $0x10] sm:$0xff] (!%p702_p9), %v277_v22  ;;  %v279_v32 = vadd.f32 (!%p702_p9), %v267_v23, %v255_v21  ;;  %v269_v33 = vadd.f32 (!%p702_p9), %v245_v30, %v239_v29  ;;  %v246_v35 = vld [vmem:[%s1083_s3 + $0x98] sm:$0xff] (!%p702_p9)  ;;  %v247_v40 = vld [vmem:[%s1083_s3 + $0xa0] sm:$0xff] (!%p702_p9) }
  0x63   : > { %v258_v36 = vld [vmem:[#allocation2 + $0x38] sm:$0xff]  ;;  %290 = vst [vmem:[#allocation2 + $0x18] sm:$0xff] %v278_v27  ;;  %v280_v37 = vadd.f32 %v268_v28, %v256_v26  ;;  %v270_v38 = vadd.f32 %v246_v35, %v240_v34  ;;  %v241_v39 = vld [vmem:[%s1083_s3 + $0x70] sm:$0xff]  ;;  %v259_v41 = vld [vmem:[#allocation2 + $0x40] sm:$0xff] }
  0x64   : > { %291 = vst [vmem:[#allocation2 + $0x20] sm:$0xff] %v279_v32  ;;  %v281_v42 = vadd.f32 %v269_v33, %v257_v31  ;;  %v271_v43 = vadd.f32 %v247_v40, %v241_v39  ;;  %v242_v44 = vld [vmem:[%s1083_s3 + $0x78] sm:$0xff]  ;;  %v248_v45 = vld [vmem:[%s1083_s3 + $0xa8] sm:$0xff]  ;;  %v243_v49 = vld [vmem:[%s1083_s3 + $0x80] sm:$0xff] }
  0x65   : > { %v260_v46 = vld [vmem:[#allocation2 + $0x48] sm:$0xff]  ;;  %292 = vst [vmem:[#allocation2 + $0x28] sm:$0xff] %v280_v37  ;;  %v282_v47 = vadd.f32 %v270_v38, %v258_v36  ;;  %v272_v48 = vadd.f32 %v248_v45, %v242_v44  ;;  %v249_v50 = vld [vmem:[%s1083_s3 + $0xb0] sm:$0xff]  ;;  %v250_v55 = vld [vmem:[%s1083_s3 + $0xb8] sm:$0xff] }
  0x66   : > { %v261_v51 = vld [vmem:[#allocation2 + $0x50] sm:$0xff]  ;;  %293 = vst [vmem:[#allocation2 + $0x30] sm:$0xff] %v281_v42  ;;  %v283_v52 = vadd.f32 %v271_v43, %v259_v41  ;;  %v273_v53 = vadd.f32 %v249_v50, %v243_v49  ;;  %v244_v54 = vld [vmem:[%s1083_s3 + $0x88] sm:$0xff]  ;;  %v262_v56 = vld [vmem:[#allocation2 + $0x58] sm:$0xff] }
  0x67   : > { %294 = vst [vmem:[#allocation2 + $0x38] sm:$0xff] %v282_v47  ;;  %v284_v57 = vadd.f32 %v272_v48, %v260_v46  ;;  %v274_v58 = vadd.f32 %v250_v55, %v244_v54 }
  0x68   : > { %295 = vst [vmem:[#allocation2 + $0x40] sm:$0xff] %v283_v52  ;;  %v285_v59 = vadd.f32 %v273_v53, %v261_v51 }
  0x69   : > { %296 = vst [vmem:[#allocation2 + $0x48] sm:$0xff] %v284_v57  ;;  %v286_v60 = vadd.f32 %v274_v58, %v262_v56 }
  0x6a   : > { %297 = vst [vmem:[#allocation2 + $0x50] sm:$0xff] %v285_v59 }
  0x6b   : > { %298 = vst [vmem:[#allocation2 + $0x58] sm:$0xff] %v286_v60 }
  0x6c PF: > { %p703_p12 = scmp.le.s32.totalorder %s1102_s26, 40 }
  0x6d   : > { %v303_v61 = vlaneseq (!%p703_p12)  ;;  %v306_v62 = vstv (!%p703_p12), %s701_s25  ;;  %v311_v0 = vld [vmem:[%s1083_s3] sm:$0xff] (!%p703_p12)  ;;  %v317_v3 = vld [vmem:[%s1083_s3 + $0x30] sm:$0xff] (!%p703_p12)  ;;  %v312_v4 = vld [vmem:[%s1083_s3 + $0x8] sm:$0xff] (!%p703_p12) }
  0x6e   : > { %302 = sbr.rel (%p703_p12) target bundleno = 132 (0x84), region = 40  ;;  %v313_v5 = vld [vmem:[%s1083_s3 + $0x10] sm:$0xff] (!%p703_p12)  ;;  %v314_v6 = vld [vmem:[%s1083_s3 + $0x18] sm:$0xff] (!%p703_p12)  ;;  %v315_v8 = vld [vmem:[%s1083_s3 + $0x20] sm:$0xff] (!%p703_p12) }
  0x6f   : > { %v304_v63 = vshrl.u32 (!%p703_p12), %v303_v61, 7  ;;  %v318_v7 = vld [vmem:[%s1083_s3 + $0x38] sm:$0xff] (!%p703_p12)  ;;  %v316_v9 = vld [vmem:[%s1083_s3 + $0x28] sm:$0xff] (!%p703_p12)  ;;  %v319_v11 = vld [vmem:[%s1083_s3 + $0x40] sm:$0xff] (!%p703_p12) }
  0x70   : > { %v320_v12 = vld [vmem:[%s1083_s3 + $0x48] sm:$0xff] (!%p703_p12)  ;;  %v323_v13 = vld [vmem:[%s1083_s3 + $0x60] sm:$0xff] (!%p703_p12)  ;;  %v321_v20 = vld [vmem:[%s1083_s3 + $0x50] sm:$0xff] (!%p703_p12) }
  0x71   : > { %v305_v1 = vadd.s32 (!%p703_p12), 8, %v304_v63  ;;  %v1133_v2 = vadd.s32 (!%p703_p12), %v306_v62, %v304_v63  ;;  %v363_v15 = vld [vmem:[#allocation2] sm:$0xff] (!%p703_p12)  ;;  %v364_v17 = vld [vmem:[#allocation2 + $0x8] sm:$0xff] (!%p703_p12)  ;;  %v322_v21 = vld [vmem:[%s1083_s3 + $0x58] sm:$0xff] (!%p703_p12) }
  0x72   : > { %v329_v24 = vld [vmem:[%s1083_s3 + $0x90] sm:$0xff] (!%p703_p12)  ;;  %v324_v26 = vld [vmem:[%s1083_s3 + $0x68] sm:$0xff] (!%p703_p12)  ;;  %v367_v37 = vld [vmem:[#allocation2 + $0x20] sm:$0xff] (!%p703_p12) }
  0x73   : > { %v1142_v10 = vadd.s32 (!%p703_p12), %v306_v62, %v305_v1  ;;  %vm309_vm0 = vcmp.lt.s32.totalorder (!%p703_p12), %v1133_v2, 40  ;;  %v365_v30 = vld [vmem:[#allocation2 + $0x10] sm:$0xff] (!%p703_p12)  ;;  %v366_v32 = vld [vmem:[#allocation2 + $0x18] sm:$0xff] (!%p703_p12)  ;;  %v331_v44 = vld [vmem:[%s1083_s3 + $0xa0] sm:$0xff] (!%p703_p12) }
  0x74   : > { %v339_v14 = vsel (!%p703_p12), %vm309_vm0, %v311_v0, 0.0  ;;  %v340_v16 = vsel (!%p703_p12), %vm309_vm0, %v312_v4, 0.0  ;;  %v341_v18 = vsel (!%p703_p12), %vm309_vm0, %v313_v5, 0.0  ;;  %v342_v19 = vsel (!%p703_p12), %vm309_vm0, %v314_v6, 0.0  ;;  %v330_v38 = vld [vmem:[%s1083_s3 + $0x98] sm:$0xff] (!%p703_p12)  ;;  %v325_v39 = vld [vmem:[%s1083_s3 + $0x70] sm:$0xff] (!%p703_p12) }
  0x75   : > { %vm310_vm1 = vcmp.lt.s32.totalorder %v1142_v10, 40  ;;  %v343_v22 = vsel %vm309_vm0, %v315_v8, 0.0  ;;  %v344_v23 = vsel %vm309_vm0, %v316_v9, 0.0  ;;  %v351_v25 = vsel %vm309_vm0, %v323_v13, 0.0  ;;  %v326_v45 = vld [vmem:[%s1083_s3 + $0x78] sm:$0xff]  ;;  %v368_v50 = vld [vmem:[#allocation2 + $0x28] sm:$0xff] }
  0x76   : > { %v345_v27 = vsel %vm310_vm1, %v317_v3, 0.0  ;;  %v346_v28 = vsel %vm310_vm1, %v318_v7, 0.0  ;;  %v347_v29 = vsel %vm310_vm1, %v319_v11, 0.0  ;;  %v348_v31 = vsel %vm310_vm1, %v320_v12, 0.0  ;;  %v369_v51 = vld [vmem:[#allocation2 + $0x30] sm:$0xff]  ;;  %v370_v52 = vld [vmem:[#allocation2 + $0x38] sm:$0xff] }
  0x77   : > { %v375_v33 = vadd.f32 %v345_v27, %v339_v14  ;;  %v376_v34 = vadd.f32 %v346_v28, %v340_v16  ;;  %v377_v35 = vadd.f32 %v347_v29, %v341_v18  ;;  %v378_v36 = vadd.f32 %v348_v31, %v342_v19  ;;  %v332_v57 = vld [vmem:[%s1083_s3 + $0xa8] sm:$0xff]  ;;  %v327_v58 = vld [vmem:[%s1083_s3 + $0x80] sm:$0xff]  ;;  %v333_v59 = vld [vmem:[%s1083_s3 + $0xb0] sm:$0xff] }
  0x78   : > { %v349_v40 = vsel %vm310_vm1, %v321_v20, 0.0  ;;  %v350_v41 = vsel %vm310_vm1, %v322_v21, 0.0  ;;  %v357_v42 = vsel %vm310_vm1, %v329_v24, 0.0  ;;  %v352_v43 = vsel %vm309_vm0, %v324_v26, 0.0  ;;  %v371_v63 = vld [vmem:[#allocation2 + $0x40] sm:$0xff]  ;;  %v328_v1 = vld [vmem:[%s1083_s3 + $0x88] sm:$0xff] }
  0x79   : > { %v387_v46 = vadd.f32 %v375_v33, %v363_v15  ;;  %v388_v47 = vadd.f32 %v376_v34, %v364_v17  ;;  %v389_v48 = vadd.f32 %v377_v35, %v365_v30  ;;  %v390_v49 = vadd.f32 %v378_v36, %v366_v32  ;;  %v334_v7 = vld [vmem:[%s1083_s3 + $0xb8] sm:$0xff]  ;;  %v372_v11 = vld [vmem:[#allocation2 + $0x48] sm:$0xff]  ;;  %v373_v14 = vld [vmem:[#allocation2 + $0x50] sm:$0xff] }
  0x7a   : > { %v379_v53 = vadd.f32 %v349_v40, %v343_v22  ;;  %v380_v54 = vadd.f32 %v350_v41, %v344_v23  ;;  %v381_v55 = vadd.f32 %v357_v42, %v351_v25  ;;  %v358_v56 = vsel %vm310_vm1, %v330_v38, 0.0  ;;  %v374_v20 = vld [vmem:[#allocation2 + $0x58] sm:$0xff] }
  0x7b   : > { %399 = vst [vmem:[#allocation2] sm:$0xff] %v387_v46  ;;  %400 = vst [vmem:[#allocation2 + $0x8] sm:$0xff] %v388_v47  ;;  %v382_v60 = vadd.f32 %v358_v56, %v352_v43  ;;  %v353_v61 = vsel %vm309_vm0, %v325_v39, 0.0  ;;  %v359_v62 = vsel %vm310_vm1, %v331_v44, 0.0  ;;  %v354_v0 = vsel %vm309_vm0, %v326_v45, 0.0 }
  0x7c   : > { %401 = vst [vmem:[#allocation2 + $0x10] sm:$0xff] %v389_v48  ;;  %402 = vst [vmem:[#allocation2 + $0x18] sm:$0xff] %v390_v49  ;;  %v391_v3 = vadd.f32 %v379_v53, %v367_v37  ;;  %v392_v4 = vadd.f32 %v380_v54, %v368_v50  ;;  %v393_v5 = vadd.f32 %v381_v55, %v369_v51  ;;  %v360_v9 = vsel %vm310_vm1, %v332_v57, 0.0 }
  0x7d   : > { %v383_v6 = vadd.f32 %v359_v62, %v353_v61  ;;  %v394_v8 = vadd.f32 %v382_v60, %v370_v52  ;;  %v355_v12 = vsel %vm309_vm0, %v327_v58, 0.0  ;;  %v361_v13 = vsel %vm310_vm1, %v333_v59, 0.0 }
  0x7e   : > { %403 = vst [vmem:[#allocation2 + $0x20] sm:$0xff] %v391_v3  ;;  %404 = vst [vmem:[#allocation2 + $0x28] sm:$0xff] %v392_v4  ;;  %v384_v16 = vadd.f32 %v360_v9, %v354_v0  ;;  %v385_v17 = vadd.f32 %v361_v13, %v355_v12  ;;  %v356_v18 = vsel %vm309_vm0, %v328_v1, 0.0  ;;  %v362_v19 = vsel %vm310_vm1, %v334_v7, 0.0 }
  0x7f   : > { %405 = vst [vmem:[#allocation2 + $0x30] sm:$0xff] %v393_v5  ;;  %v395_v15 = vadd.f32 %v383_v6, %v371_v63  ;;  %406 = vst [vmem:[#allocation2 + $0x38] sm:$0xff] %v394_v8  ;;  %v386_v23 = vadd.f32 %v362_v19, %v356_v18 }
  0x80   : > { %v396_v21 = vadd.f32 %v384_v16, %v372_v11  ;;  %v397_v22 = vadd.f32 %v385_v17, %v373_v14 }
  0x81   : > { %407 = vst [vmem:[#allocation2 + $0x40] sm:$0xff] %v395_v15  ;;  %v398_v24 = vadd.f32 %v386_v23, %v374_v20 }
  0x82   : > { %408 = vst [vmem:[#allocation2 + $0x48] sm:$0xff] %v396_v21  ;;  %409 = vst [vmem:[#allocation2 + $0x50] sm:$0xff] %v397_v22 }
  0x83   : > { %410 = vst [vmem:[#allocation2 + $0x58] sm:$0xff] %v398_v24 }
  0x84 PF: > { %p704_p13 = scmp.ne.s32.totalorder %s922_s12, 1 }
  0x85   : > { %v415_v25 = vld [vmem:[#allocation2] sm:$0xff] (!%p704_p13)  ;;  %v416_v2 = vld [vmem:[#allocation2 + $0x8] sm:$0xff] (!%p704_p13)  ;;  %v417_v26 = vld [vmem:[#allocation2 + $0x10] sm:$0xff] (!%p704_p13)  ;;  %v516_v27 = vlaneseq (!%p704_p13)  ;;  %v946_v33 = vmov (!%p704_p13), 1983009808   ;;  %vm566_vm2 = vcmask (!%p704_p13), 1041409  }
  0x86   : > { %414 = sbr.rel (%p704_p13) target bundleno = 171 (0xab), region = 44  ;;  %v418_v28 = vld [vmem:[#allocation2 + $0x18] sm:$0xff] (!%p704_p13)  ;;  %v421_v10 = vld [vmem:[#allocation2 + $0x30] sm:$0xff] (!%p704_p13)  ;;  %v427_v30 = vrot.slane (!%p704_p13), %v415_v25, 4  ;;  %v433_v31 = vrot.slane (!%p704_p13), %v416_v2, 4  ;;  %v439_v32 = vrot.slane (!%p704_p13), %v417_v26, 4  ;;  %v514_v34 = vunpack.c.l.s4 (!%p704_p13), %v946_v33 }
  0x87   : > { %v422_v29 = vld [vmem:[#allocation2 + $0x38] sm:$0xff] (!%p704_p13)  ;;  %v445_v37 = vrot.slane (!%p704_p13), %v418_v28, 4  ;;  %v463_v38 = vrot.slane (!%p704_p13), %v421_v10, 4  ;;  %v517_v40 = vshrl.u32 (!%p704_p13), %v516_v27, 7  ;;  %v419_v19 = vld [vmem:[#allocation2 + $0x20] sm:$0xff] (!%p704_p13)  ;;  %v420_v20 = vld [vmem:[#allocation2 + $0x28] sm:$0xff] (!%p704_p13) }
  0x88   : > { %v423_v35 = vld [vmem:[#allocation2 + $0x40] sm:$0xff] (!%p704_p13)  ;;  %v469_v39 = vrot.slane (!%p704_p13), %v422_v29, 4  ;;  %v428_v41 = vadd.f32 (!%p704_p13), %v427_v30, %v415_v25  ;;  %v434_v42 = vadd.f32 (!%p704_p13), %v433_v31, %v416_v2  ;;  %v440_v43 = vadd.f32 (!%p704_p13), %v439_v32, %v417_v26 }
  0x89   : > { %v424_v36 = vld [vmem:[#allocation2 + $0x48] sm:$0xff] (!%p704_p13)  ;;  %v475_v44 = vrot.slane (!%p704_p13), %v423_v35, 4  ;;  %v446_v45 = vadd.f32 (!%p704_p13), %v445_v37, %v418_v28  ;;  %v464_v46 = vadd.f32 (!%p704_p13), %v463_v38, %v421_v10  ;;  %v515_v23 = vunpack.c.0.s8 (!%p704_p13), %v514_v34  ;;  %v425_v24 = vld [vmem:[#allocation2 + $0x50] sm:$0xff] (!%p704_p13) }
  0x8a   : > { %v470_v47 = vadd.f32 (!%p704_p13), %v469_v39, %v422_v29  ;;  %v481_v48 = vrot.slane (!%p704_p13), %v424_v36, 4  ;;  %v429_v49 = vrot.slane (!%p704_p13), %v428_v41, 2  ;;  %v435_v50 = vrot.slane (!%p704_p13), %v434_v42, 2  ;;  %v426_v25 = vld [vmem:[#allocation2 + $0x58] sm:$0xff] (!%p704_p13) }
  0x8b   : > { %v441_v51 = vrot.slane (!%p704_p13), %v440_v43, 2  ;;  %v476_v52 = vadd.f32 (!%p704_p13), %v475_v44, %v423_v35  ;;  %v447_v53 = vrot.slane (!%p704_p13), %v446_v45, 2  ;;  %v465_v54 = vrot.slane (!%p704_p13), %v464_v46, 2 }
  0x8c   : > { %v471_v55 = vrot.slane (!%p704_p13), %v470_v47, 2  ;;  %v482_v56 = vadd.f32 (!%p704_p13), %v481_v48, %v424_v36  ;;  %v430_v57 = vadd.f32 (!%p704_p13), %v429_v49, %v428_v41  ;;  %v436_v58 = vadd.f32 (!%p704_p13), %v435_v50, %v434_v42 }
  0x8d   : > { %v442_v59 = vadd.f32 %v441_v51, %v440_v43  ;;  %v477_v60 = vrot.slane %v476_v52, 2  ;;  %v448_v61 = vadd.f32 %v447_v53, %v446_v45  ;;  %v466_v62 = vadd.f32 %v465_v54, %v464_v46 }
  0x8e   : > { %v472_v63 = vadd.f32 %v471_v55, %v470_v47  ;;  %v483_v0 = vrot.slane %v482_v56, 2  ;;  %v431_v1 = vrot.slane %v430_v57, 1  ;;  %v437_v3 = vrot.slane %v436_v58, 1 }
  0x8f   : > { %v443_v4 = vrot.slane %v442_v59, 1  ;;  %v478_v5 = vadd.f32 %v477_v60, %v476_v52  ;;  %v449_v6 = vrot.slane %v448_v61, 1  ;;  %v467_v7 = vrot.slane %v466_v62, 1 }
  0x90   : > { %v473_v8 = vrot.slane %v472_v63, 1  ;;  %v484_v9 = vadd.f32 %v483_v0, %v482_v56  ;;  %v432_v11 = vadd.f32 %v431_v1, %v430_v57  ;;  %v438_v12 = vadd.f32 %v437_v3, %v436_v58 }
  0x91   : > { %v444_v13 = vadd.f32 %v443_v4, %v442_v59  ;;  %v479_v14 = vrot.slane %v478_v5, 1  ;;  %v450_v15 = vadd.f32 %v449_v6, %v448_v61  ;;  %v468_v16 = vadd.f32 %v467_v7, %v466_v62 }
  0x92   : > { %v474_v17 = vadd.f32 %v473_v8, %v472_v63  ;;  %v485_v18 = vrot.slane %v484_v9, 1  ;;  %v511_v22 = vcombine.low %v432_v11, %v438_v12  ;;  %v518_v28 = vsub.s32 %v515_v23, %v517_v40 }
  0x93   : > { %v480_v21 = vadd.f32 %v479_v14, %v478_v5  ;;  %v512_v26 = vcombine.low %v444_v13, %v450_v15  ;;  %v451_v10 = vrot.slane %v419_v19, 4  ;;  %v457_v29 = vrot.slane %v420_v20, 4 }
  0x94   : > { %v486_v2 = vadd.f32 %v485_v18, %v484_v9  ;;  %v536_v27 = vcombine.low %v468_v16, %v474_v17  ;;  %v487_v31 = vrot.slane %v425_v24, 4  ;;  %v493_v32 = vrot.slane %v426_v25, 4 }
  0x95   : > { %v519_v33 = vrot.slane %v511_v22, %v518_v28  ;;  %v526_v35 = vrot.slane %v512_v26, %v518_v28  ;;  %v452_v37 = vadd.f32 %v451_v10, %v419_v19  ;;  %v458_v39 = vadd.f32 %v457_v29, %v420_v20 }
  0x96   : > { %v537_v30 = vcombine.low %v480_v21, %v486_v2  ;;  %v544_v36 = vrot.slane %v536_v27, %v518_v28  ;;  %v488_v41 = vadd.f32 %v487_v31, %v425_v24  ;;  %v494_v42 = vadd.f32 %v493_v32, %v426_v25 }
  0x97   : > { %v527_v34 = vcombine.low %v519_v33, %v526_v35  ;;  %v453_v43 = vrot.slane %v452_v37, 2  ;;  %v459_v45 = vrot.slane %v458_v39, 2  ;;  %vm568_vm3 = vcmask 1043459  }
  0x98   : > { %v551_v38 = vrot.slane %v537_v30, %v518_v28  ;;  %v489_v46 = vrot.slane %v488_v41, 2  ;;  %v495_v47 = vrot.slane %v494_v42, 2  ;;  %vm570_vm4 = vcmask 1045509  }
  0x99   : > { %v454_v40 = vadd.f32 %v453_v43, %v452_v37  ;;  %v460_v49 = vadd.f32 %v459_v45, %v458_v39  ;;  %vm572_vm5 = vcmask 1047559  }
  0x9a   : > { %v552_v44 = vcombine.low %v544_v36, %v551_v38  ;;  %v490_v50 = vadd.f32 %v489_v46, %v488_v41  ;;  %v496_v51 = vadd.f32 %v495_v47, %v494_v42 }
  0x9b   : > { %v455_v52 = vrot.slane %v454_v40, 1  ;;  %v461_v54 = vrot.slane %v460_v49, 1 }
  0x9c   : > { %v565_v48 = vrot.slane %v552_v44, 7  ;;  %v491_v55 = vrot.slane %v490_v50, 1  ;;  %v497_v56 = vrot.slane %v496_v51, 1 }
  0x9d   : > { %v456_v58 = vadd.f32 %v455_v52, %v454_v40  ;;  %v462_v60 = vadd.f32 %v461_v54, %v460_v49 }
  0x9e   : > { %v567_v53 = vsel %vm566_vm2, %v565_v48, %v527_v34  ;;  %v492_v61 = vadd.f32 %v491_v55, %v490_v50  ;;  %v498_v62 = vadd.f32 %v497_v56, %v496_v51 }
  0x9f   : > { %v569_v57 = vsel %vm568_vm3, %v565_v48, %v567_v53  ;;  %v528_v0 = vcombine.low %v456_v58, %v462_v60 }
  0xa0   : > { %v571_v59 = vsel %vm570_vm4, %v565_v48, %v569_v57  ;;  %v553_v1 = vcombine.low %v492_v61, %v498_v62 }
  0xa1   : > { %v573_v63 = vsel %vm572_vm5, %v565_v48, %v571_v59  ;;  %v535_v3 = vrot.slane %v528_v0, %v518_v28 }
  0xa2   : > { %583 = vst [vmem:[%s1092_s20] sm:$0xff] %v573_v63  ;;  %v560_v4 = vrot.slane %v553_v1, %v518_v28 }
  0xa4   : > { %v576_v5 = vrot.slane %v560_v4, 7 }
  0xa6   : > { %v577_v6 = vsel %vm566_vm2, %v576_v5, %v535_v3 }
  0xa7   : > { %v578_v7 = vsel %vm568_vm3, %v576_v5, %v577_v6 }
  0xa8   : > { %v579_v8 = vsel %vm570_vm4, %v576_v5, %v578_v7 }
  0xa9   : > { %v580_v9 = vsel %vm572_vm5, %v576_v5, %v579_v8 }
  0xaa   : > { %584 = vst [vmem:[%s1092_s20 + $0x8] sm:$0xf] %v580_v9 }
  0xab PF: > { %s712_s12 = smul.u32 192, %s926_s13  ;;  %s600_s27 = sshll.u32 %s1092_s20, 4  ;;  %s601_s27 = int_to_ptr.vmem [resolvable:$true] %s600_s27 }
  0xac   : > { %s586_s17 = scalar_lea.sflag [#allocation5], %s190_s11  ;;  %s816_s9 = scalar_lea.vmem %s601_s27, 192 }
  0xad   : > { %s1226_s24 = scalar_lea.hbm %s1285_s1, %s712_s12  ;;  %p817_p0 = scmp.ne.s32.totalorder %s601_s27, %s816_s9 }
  0xae   : > { %s947_s18 = smov [#allocation6]  }
  0xaf   : > { %p818_p1 = pnand %p817_p0, %p1062_p2  ;;  %s820_s22 = sshll.u32 %s947_s18, 4  ;;  %s821_s22 = int_to_ptr.vmem [resolvable:$false] %s820_s22 }
  0xb0   : > { %s822_s14 = scalar_lea.vmem %s821_s22, 384  ;;  %p823_p6 = scmp.lt.s32.totalorder %s601_s27, %s821_s22 }
  0xb1   : > { %p819_p4 = pneg %p818_p1  ;;  %p824_p7 = scmp.lt.s32.totalorder %s822_s14, %s816_s9 }
  0xb3   : > { %p825_p5 = por %p824_p7, %p823_p6 }
  0xb5   : > { %p826_p8 = pnand %p825_p5, %p819_p4 }
  0xb7   : > { %829 = shalt.err (!%p826_p8)
}
  0xb8   : > { %s830_s13 = scalar_lea.hbm %s1226_s24, 192  ;;  %s834_s3 = scalar_lea.hbm %s1285_s1, 384 }
  0xb9   : > { %p831_p10 = scmp.ne.s32.totalorder %s1226_s24, %s830_s13  ;;  %p835_p12 = scmp.lt.u32.totalorder %s1226_s24, %s1285_s1 }
  0xba   : > { %p836_p13 = scmp.lt.u32.totalorder %s834_s3, %s830_s13  ;;  %p838_p1 = scmp.lt.u32.totalorder %s830_s13, %s1226_s24 }
  0xbb   : > { %p832_p11 = pnand %p831_p10, %p1062_p2 }
  0xbc   : > { %p837_p0 = por %p836_p13, %p835_p12 }
  0xbd   : > { %p833_p9 = pneg %p832_p11 }
  0xbe   : > { %p839_p4 = por %p838_p1, %p837_p0 }
  0xc0   : > { %p840_p6 = pnand %p839_p4, %p833_p9 }
  0xc2   : > { %843 = shalt.err (!%p840_p6)
}
  0xc3   : > { %714 = dma.vmem_to_hbm [thread:$0]  (%p1062_p2), %s601_s27, 192, %s1226_s24, %s586_s17  }
  0xc4 PF: > { %p720_p7 = scmp.ge.s32.totalorder %s938_s16, 2  ;;  %s612_s20 = sand.u32 1, %s898_s6  }
  0xc5   : > { %s613_s28 = scalar_lea.sflag [#allocation5], %s612_s20 }
  0xc6   : > { %p717_p5 = pnand %p720_p7, %p1066_p3 }
  0xc8   : > { %893 = dma.done.wait (!%p717_p5), %s613_s28, 192  }
  0xc9   : > { %895 = vsyncadd (!%p717_p5), %s613_s28, 4294967104  ;;  %s17_s16 = sadd.s32 1, %s938_s16   ;;  %s1301_s4 = sld [smem:[#allocation11_spill]] }
  0xca   : > { %p14_p8 = scmp.ge.s32.totalorder %s17_s16, 6   ;;  %s1302_s11 = sld [smem:[#allocation16_spill]] }
  0xcb   : > { %s1303_s12 = sld [smem:[#allocation12_spill]]  ;;  %s1304_s13 = sld [smem:[#allocation13_spill]] }
  0xcc   : > { %s1305_s14 = sld [smem:[#allocation14_spill]]  ;;  %s1306_s15 = sld [smem:[#allocation15_spill]] }
  0xcd   : > { %s1307_s6 = smov %s902_s7  ;;  %s1308_s7 = smov %s906_s8 }
  0xce   : > { %s1309_s8 = smov %s1048_s30  ;;  %s1310_s9 = smov %s914_s10 }
  0xcf   : > { %s1311_s10 = smov %s1301_s4  ;;  %16 = sbr.rel (!%p14_p8) target bundleno = 9 (0x9), region = 90 }
  0xd6   :  { %618 = vsyncpa [#allocation4], 1 }
  0xd7   :  { %620 = vsyncpa [#allocation4 + $0x1], 1 }
  0xd8   :  { %621 = vsyncpa [#allocation5], 1 }
  0xd9   :  { %623 = vsyncpa [#allocation5 + $0x1], 1 }

</bundles_post_ra>
